<compile_context>
chip_gen: v7x
topology: tpu7x:2x2x1
jax: 0.10.0
libtpu: 0.0.40
codegen_flags: <defaults>
</compile_context>

<pallas_src>
import functools

import jax
import jax.numpy as jnp
from jax.experimental import pallas as pl
from jax.experimental.pallas import tpu as pltpu

EPS = 1e-5


def _linear_bn_kernel(x_ref, w_ref, g_ref, be_ref, o_ref, *, relu, inv_n):
    # x_ref : (N, K)  bf16 — full batch, resident across all feature tiles.
    # w_ref : (K, TJ) bf16 — streamed weight tile.
    # g_ref, be_ref : (1, TJ) f32 — BN gamma / beta tile.
    # o_ref : (N, TJ)      — output tile (bf16 for hidden layers, f32 final).
    h = jnp.dot(x_ref[...], w_ref[...], preferred_element_type=jnp.float32)

    # Single-pass batch statistics (biased variance), per feature column.
    s = jnp.sum(h, axis=0, keepdims=True)
    sq = jnp.sum(h * h, axis=0, keepdims=True)
    mean = s * inv_n
    var = jnp.maximum(sq * inv_n - mean * mean, 0.0)
    scale = jax.lax.rsqrt(var + EPS) * g_ref[...]
    h = (h - mean) * scale + be_ref[...]
    if relu:
        h = jnp.maximum(h, 0.0)
    o_ref[...] = h.astype(o_ref.dtype)


def _vmem_budget(n, k, tj, out_itemsize):
    x_b = n * k * 2               # resident bf16 activation slab
    w_b = k * tj * 2              # bf16 weight tile
    o_b = n * tj * out_itemsize   # output tile
    gb_b = 2 * tj * 4             # gamma + beta tiles
    need = 2 * (x_b + w_b + o_b + gb_b) + (4 << 20)   # double buffers + headroom
    return int(min(max(need, 8 << 20), 48 << 20))     # <=48 MiB: safe on v7x


def _linear_bn(x_bf16, w_bf16, gamma, beta, *, relu, out_dtype, tile_j):
    n, k = x_bf16.shape
    kw, j = w_bf16.shape
    assert kw == k
    tj = tile_j if j % tile_j == 0 else j
    grid = (j // tj,)
    kernel = functools.partial(_linear_bn_kernel, relu=relu, inv_n=1.0 / n)
    return pl.pallas_call(
        kernel,
        out_shape=jax.ShapeDtypeStruct((n, j), out_dtype),
        grid=grid,
        in_specs=[
            pl.BlockSpec((n, k), lambda jb: (0, 0)),    # batch slab (loaded once)
            pl.BlockSpec((k, tj), lambda jb: (0, jb)),  # streamed weight tile
            pl.BlockSpec((1, tj), lambda jb: (0, jb)),  # gamma tile
            pl.BlockSpec((1, tj), lambda jb: (0, jb)),  # beta tile
        ],
        out_specs=pl.BlockSpec((n, tj), lambda jb: (0, jb)),
        compiler_params=pltpu.CompilerParams(
            dimension_semantics=("parallel",),
            vmem_limit_bytes=_vmem_budget(n, k, tj, jnp.dtype(out_dtype).itemsize),
        ),
    )(x_bf16, w_bf16, gamma, beta)


def projection_mlp(x, params, *, tile_j=256):
    """x: (N, in_dim) float32. tile_j: 256 for v6e/v7x MXU, 128 on v5e."""
    h = _linear_bn(x.astype(jnp.bfloat16), params["w1"], params["g1"], params["be1"],
                   relu=True, out_dtype=jnp.bfloat16, tile_j=tile_j)
    h = _linear_bn(h, params["w2"], params["g2"], params["be2"],
                   relu=True, out_dtype=jnp.bfloat16, tile_j=tile_j)
    h = _linear_bn(h, params["w3"], params["g3"], params["be3"],
                   relu=False, out_dtype=jnp.float32, tile_j=tile_j)
    return h


def init_params(key, in_dim, hidden_dim, out_dim):
    """PyTorch nn.Linear default init. Weights stored bf16 (halves weight DMA);
    biases kept in f32 only for the reference — the kernel drops them since
    training-mode BN cancels any constant per-feature shift."""
    ks = jax.random.split(key, 6)

    def linear(kw, kb, fan_in, fan_out):
        bound = 1.0 / jnp.sqrt(jnp.float32(fan_in))
        w = jax.random.uniform(kw, (fan_in, fan_out), jnp.float32, -bound, bound)
        b = jax.random.uniform(kb, (1, fan_out), jnp.float32, -bound, bound)
        return w.astype(jnp.bfloat16), b

    w1, b1 = linear(ks[0], ks[1], in_dim, hidden_dim)
    w2, b2 = linear(ks[2], ks[3], hidden_dim, hidden_dim)
    w3, b3 = linear(ks[4], ks[5], hidden_dim, out_dim)
    ones = lambda d: jnp.ones((1, d), jnp.float32)
    zeros = lambda d: jnp.zeros((1, d), jnp.float32)
    return {
        "w1": w1, "b1": b1, "g1": ones(hidden_dim), "be1": zeros(hidden_dim),
        "w2": w2, "b2": b2, "g2": ones(hidden_dim), "be2": zeros(hidden_dim),
        "w3": w3, "b3": b3, "g3": ones(out_dim), "be3": zeros(out_dim),
    }


def projection_mlp_ref(x, p):
    """Pure-f32 JAX reference matching PyTorch semantics (with Linear biases)."""
    def bn(h, g, be):
        m = jnp.mean(h, axis=0, keepdims=True)
        v = jnp.mean((h - m) ** 2, axis=0, keepdims=True)
        return (h - m) / jnp.sqrt(v + EPS) * g + be

    f32 = lambda a: a.astype(jnp.float32)
    h = x @ f32(p["w1"]) + p["b1"]
    h = jnp.maximum(bn(h, p["g1"], p["be1"]), 0.0)
    h = h @ f32(p["w2"]) + p["b2"]
    h = jnp.maximum(bn(h, p["g2"], p["be2"]), 0.0)
    h = h @ f32(p["w3"]) + p["b3"]
    return bn(h, p["g3"], p["be3"])


if __name__ == "__main__":
    # Scaled-down SimSiam shapes (module defaults: hidden=out=2048). The
    # original module's layer3 uses BatchNorm1d(hidden_dim), so out_dim must
    # equal hidden_dim for the spec to be well-formed.
    N, IN_DIM, HIDDEN, OUT = 64, 128, 512, 512

    key = jax.random.PRNGKey(0)
    kx, kp = jax.random.split(key)
    x = jax.random.normal(kx, (N, IN_DIM), jnp.float32)
    params = init_params(kp, IN_DIM, HIDDEN, OUT)

    out = jax.block_until_ready(projection_mlp(x, params))
    ref = projection_mlp_ref(x, params)

    assert out.shape == (N, OUT), out.shape
    # bf16 MXU operands => loosened tolerance vs the pure-f32 reference.
    max_err = float(jnp.max(jnp.abs(out - ref)))
    assert jnp.allclose(out, ref, atol=5e-2, rtol=5e-2), max_err

    print("KERNEL_OK")
</pallas_src>

<mosaic_0001>
module attributes {stable_mosaic.version = 11 : i64} {
  func.func @_linear_bn_kernel(%arg0: i32, %arg1: memref<64x128xbf16, #tpu.memory_space<vmem>>, %arg2: memref<128x256xbf16, #tpu.memory_space<vmem>>, %arg3: memref<1x256xf32, #tpu.memory_space<vmem>>, %arg4: memref<1x256xf32, #tpu.memory_space<vmem>>, %arg5: memref<64x256xbf16, #tpu.memory_space<vmem>>) attributes {dimension_semantics = [#tpu.dimension_semantics<parallel>], iteration_bounds = array<i64: 2>, scalar_prefetch = 0 : i64, scratch_operands = 0 : i64, tpu.core_type = #tpu.core_type<tc>, window_params = [{pipeline_mode = #tpu.pipeline_mode<synchronous>, transform_indices = @transform_0, window_bounds = array<i64: 64, 128>}, {transform_indices = @transform_1, window_bounds = array<i64: 128, 256>}, {transform_indices = @transform_2, window_bounds = array<i64: 1, 256>}, {transform_indices = @transform_3, window_bounds = array<i64: 1, 256>}, {transform_indices = @transform_4, window_bounds = array<i64: 64, 256>}]} {
    %c0 = arith.constant 0 : index
    %c0_0 = arith.constant 0 : index
    %0 = vector.load %arg1[%c0, %c0_0] : memref<64x128xbf16, #tpu.memory_space<vmem>>, vector<64x128xbf16>
    %c0_1 = arith.constant 0 : index
    %c0_2 = arith.constant 0 : index
    %1 = vector.load %arg2[%c0_1, %c0_2] : memref<128x256xbf16, #tpu.memory_space<vmem>>, vector<128x256xbf16>
    %cst = arith.constant dense<0.000000e+00> : vector<64x256xf32>
    %2 = tpu.matmul %0, %1, %cst {dimension_numbers = #tpu.dot_dimension_numbers<[1], [0], [0], [1], [0, 0, 1, 1], [], []>} : vector<64x128xbf16>, vector<128x256xbf16>, vector<64x256xf32> -> vector<64x256xf32>
    %cst_3 = arith.constant dense<0.000000e+00> : vector<256xf32>
    %3 = vector.multi_reduction <add>, %2, %cst_3 [0] : vector<64x256xf32> to vector<256xf32>
    %4 = vector.shape_cast %3 : vector<256xf32> to vector<1x256xf32>
    %5 = arith.mulf %2, %2 : vector<64x256xf32>
    %cst_4 = arith.constant dense<0.000000e+00> : vector<256xf32>
    %6 = vector.multi_reduction <add>, %5, %cst_4 [0] : vector<64x256xf32> to vector<256xf32>
    %7 = vector.shape_cast %6 : vector<256xf32> to vector<1x256xf32>
    %cst_5 = arith.constant 1.562500e-02 : f32
    %8 = vector.broadcast %cst_5 : f32 to vector<1x256xf32>
    %9 = arith.mulf %4, %8 : vector<1x256xf32>
    %cst_6 = arith.constant 1.562500e-02 : f32
    %10 = vector.broadcast %cst_6 : f32 to vector<1x256xf32>
    %11 = arith.mulf %7, %10 : vector<1x256xf32>
    %12 = arith.mulf %9, %9 : vector<1x256xf32>
    %13 = arith.subf %11, %12 : vector<1x256xf32>
    %cst_7 = arith.constant 0.000000e+00 : f32
    %14 = vector.broadcast %cst_7 : f32 to vector<1x256xf32>
    %15 = arith.maximumf %13, %14 : vector<1x256xf32>
    %cst_8 = arith.constant 9.99999974E-6 : f32
    %16 = vector.broadcast %cst_8 : f32 to vector<1x256xf32>
    %17 = arith.addf %15, %16 : vector<1x256xf32>
    %18 = math.rsqrt %17 : vector<1x256xf32>
    %c0_9 = arith.constant 0 : index
    %c0_10 = arith.constant 0 : index
    %19 = vector.load %arg3[%c0_9, %c0_10] : memref<1x256xf32, #tpu.memory_space<vmem>>, vector<1x256xf32>
    %20 = arith.mulf %18, %19 : vector<1x256xf32>
    %21 = vector.broadcast %9 : vector<1x256xf32> to vector<64x256xf32>
    %22 = arith.subf %2, %21 : vector<64x256xf32>
    %23 = vector.broadcast %20 : vector<1x256xf32> to vector<64x256xf32>
    %24 = arith.mulf %22, %23 : vector<64x256xf32>
    %c0_11 = arith.constant 0 : index
    %c0_12 = arith.constant 0 : index
    %25 = vector.load %arg4[%c0_11, %c0_12] : memref<1x256xf32, #tpu.memory_space<vmem>>, vector<1x256xf32>
    %26 = vector.broadcast %25 : vector<1x256xf32> to vector<64x256xf32>
    %27 = arith.addf %24, %26 : vector<64x256xf32>
    %cst_13 = arith.constant 0.000000e+00 : f32
    %28 = vector.broadcast %cst_13 : f32 to vector<64x256xf32>
    %29 = arith.maximumf %27, %28 : vector<64x256xf32>
    %30 = arith.truncf %29 : vector<64x256xf32> to vector<64x256xbf16>
    %c0_14 = arith.constant 0 : index
    %c0_15 = arith.constant 0 : index
    %31 = vector.load %arg5[%c0_14, %c0_15] : memref<64x256xbf16, #tpu.memory_space<vmem>>, vector<64x256xbf16>
    tpu.vector_store %arg5[%c0_14, %c0_15], %30 {strides = array<i32>} : memref<64x256xbf16, #tpu.memory_space<vmem>>, vector<64x256xbf16>,
    return
  }
  func.func @transform_0(%arg0: i32) -> (i32, i32) {
    %c0_i32 = arith.constant 0 : i32
    %c0_i32_0 = arith.constant 0 : i32
    %c0_i32_1 = arith.constant 0 : i32
    return %c0_i32, %c0_i32_0 : i32, i32
  }
  func.func @transform_1(%arg0: i32) -> (i32, i32) {
    %c0_i32 = arith.constant 0 : i32
    %c0_i32_0 = arith.constant 0 : i32
    return %c0_i32, %arg0 : i32, i32
  }
  func.func @transform_2(%arg0: i32) -> (i32, i32) {
    %c0_i32 = arith.constant 0 : i32
    %c0_i32_0 = arith.constant 0 : i32
    return %c0_i32, %arg0 : i32, i32
  }
  func.func @transform_3(%arg0: i32) -> (i32, i32) {
    %c0_i32 = arith.constant 0 : i32
    %c0_i32_0 = arith.constant 0 : i32
    return %c0_i32, %arg0 : i32, i32
  }
  func.func @transform_4(%arg0: i32) -> (i32, i32) {
    %c0_i32 = arith.constant 0 : i32
    %c0_i32_0 = arith.constant 0 : i32
    return %c0_i32, %arg0 : i32, i32
  }
}

</mosaic_0001>

<bundles_post_ra>
// kernel: tpu_custom_call.1
= control target key start
LH: loop header
LB: loop body
LE: loop exit
PB: predicated region body
PF: predicated region fallthrough
CT: control target
= control target key end

     0   :  { %9 = vsyncpa [#allocation3], 0  ;;  %s1514_s0 = inlined_call_operand.hbm [shape: bf16[64,128], index: 0, kind: input, shape index: {}]   ;;  %s1515_s1 = inlined_call_operand.hbm [shape: bf16[128,512], index: 1, kind: input, shape index: {}]   ;;  %s1516_s2 = inlined_call_operand.vmem [shape: f32[1,512], index: 2, kind: input, shape index: {}]   ;;  %s1517_s3 = inlined_call_operand.vmem [shape: f32[1,512], index: 3, kind: input, shape index: {}]   ;;  %s1518_s4 = inlined_call_operand.hbm [shape: bf16[64,512], index: 4, kind: output, shape index: {}]  }
   0x1   :  { %10 = vsyncpa [#allocation6], 0 }
   0x2   :  { %12 = vsyncpa [#allocation6 + $0x1], 0 }
   0x3   :  { %13 = vsyncpa [#allocation4], 0 }
   0x4   :  { %15 = vsyncpa [#allocation4 + $0x1], 0  ;;  %s1163_s15 = smov 0   ;;  %s1165_s16 = smov 0  }
   0x5   :  { %s1167_s17 = smov 0   ;;  %s1169_s18 = smov 0  }
   0x6 LB: > { %s1184_s19 = sadd.s32 4294967295, %s1124_s18   ;;  %s826_s20 = sadd.s32 4294967294, %s1124_s18   ;;  %s1124_s18 = sphi %s1169_s18, %s1543_s18   ;;  %s1120_s17 = sphi %s1167_s17, %s1542_s17   ;;  %s1116_s16 = sphi %s1165_s16, %s1541_s16   ;;  %s1112_s15 = sphi %s1163_s15, %s1540_s15  }
   0x7   : > { %s1188_s21 = sadd.s32 1, %s1124_s18   ;;  %s49_s22 = sadd.s32 1, %s1120_s17 }
   0x8   : > { %s46_s23 = ssub.s32 %s1124_s18, %s1188_s21  ;;  %p56_p0 = scmp.ne.s32.totalorder %s1120_s17, %s1116_s16 }
   0x9   : > { %p47_p1 = scmp.eq.s32.totalorder %s46_s23, 0  ;;  %p57_p2 = scmp.eq.s32.totalorder %s1124_s18, 0 }
   0xa   : > { %p62_p3 = scmp.ne.s32.totalorder %s1116_s16, %s1112_s15  ;;  %p1519_p4 = scmp.eq.s32.totalorder %s1184_s19, 0 }
   0xb   : > { %s1200_s24 = scalar_select %p47_p1, %s1120_s17, %s49_s22  }
   0xc   : > { %p1202_p5 = por %p57_p2, %p56_p0  ;;  %p1208_p6 = por %p1519_p4, %p62_p3 }
   0xd   : > { %p138_p7 = scmp.eq.s32.totalorder %s1184_s19, 1  ;;  %p144_p8 = scmp.eq.s32.totalorder %s826_s20, 1 }
   0xe   : > { %s1523_s25 = scalar_select %p1202_p5, 1, 0 }
   0xf   : > { %s1524_s26 = scalar_select %p1208_p6, 1, 0 }
  0x10   : > { %p827_p9 = scmp.ge.s32.totalorder %s1124_s18, 1  ;;  %p151_p10 = scmp.lt.s32.totalorder %s1124_s18, 3 }
  0x11   : > { %p1215_p11 = por %p138_p7, %p56_p0  ;;  %p1219_p12 = por %p144_p8, %p62_p3 }
  0x12   : > { %p1223_p13 = pnand %p827_p9, %p151_p10  ;;  %s1126_s30 = smov [#allocation2]  }
  0x13   : > { %s1525_s27 = scalar_select %p1215_p11, 1, 0 }
  0x14   : > { %s1526_s28 = scalar_select %p1219_p12, 1, 0 }
  0x15   : > { %s1527_s29 = scalar_select %p1223_p13, 1, 0 }
  0x16   : > { %p906_p1 = pneg %p1223_p13  ;;  %s163_s5 = sshll.u32 %s1126_s30, 4  ;;  %s164_s5 = int_to_ptr.vmem [resolvable:$true] %s163_s5 }
  0x17   : > { %s177_s7 = sand.u32 1, %s1120_s17   ;;  %s996_s10 = scalar_lea.hbm %s1514_s0, 512 }
  0x18   : > { %p1231_p2 = pnand %p906_p1, %p1519_p4  ;;  %p997_p7 = scmp.ne.s32.totalorder %s1514_s0, %s996_s10 }
  0x19   : > { %p1003_p1 = scmp.lt.u32.totalorder %s996_s10, %s1514_s0 }
  0x1a   : > { %p998_p8 = pneg %p1231_p2 }
  0x1c   : > { %p999_p9 = pnand %p998_p8, %p997_p7 }
  0x1e   : > { %p1000_p10 = pneg %p999_p9 }
  0x20   : > { %p1005_p4 = pnand %p1003_p1, %p1000_p10 }
  0x22   : > { %1008 = shalt.err (!%p1005_p4)
}
  0x23   : > { %s1009_s20 = scalar_lea.vmem %s164_s5, 512  ;;  %p1017_p11 = scmp.lt.s32.totalorder %s164_s5, %s164_s5 }
  0x24   : > { %p1010_p0 = scmp.ne.s32.totalorder %s164_s5, %s1009_s20  ;;  %p1018_p6 = scmp.lt.s32.totalorder %s1009_s20, %s1009_s20 }
  0x26   : > { %p1012_p3 = pnand %p1010_p0, %p998_p8  ;;  %p1019_p13 = por %p1018_p6, %p1017_p11 }
  0x28   : > { %p1013_p12 = pneg %p1012_p3 }
  0x2a   : > { %p1020_p5 = pnand %p1019_p13, %p1013_p12 }
  0x2c   : > { %1023 = shalt.err (!%p1020_p5)
}
  0x2d   : > { %s1127_s22 = smov 64   ;;  %s1128_s23 = smov 4  }
  0x2e   : > { %909 = dma.hbm_to_vmem [thread:$0]  (!%p1231_p2), %s1514_s0, 512, %s164_s5, [#allocation3], %s1127_s22, %s1127_s22, %s1128_s23  }
  0x2f   : > { %p1529_p4 = scmp.ne.s32.totalorder %s1523_s25, 0  ;;  %p1530_p7 = scmp.lt.s32.totalorder %s1124_s18, 2 }
  0x30   : > { %s830_s10 = sshll.u32 %s177_s7, 7  ;;  %s872_s11 = sshll.u32 %s1124_s18, 7 }
  0x31   : > { %p1258_p0 = pnand %p1530_p7, %p1529_p4  ;;  %s1266_s14 = scalar_lea.hbm %s1515_s1, %s872_s11 }
  0x32   : > { %s181_s5 = scalar_lea.vmem [#allocation5], %s830_s10  ;;  %s1270_s6 = scalar_lea.sflag [#allocation6], %s177_s7 }
  0x33   : > { %s188_s25 = sshll.u32 %s181_s5, 4  ;;  %s1024_s20 = scalar_lea.hbm %s1266_s14, 2048  ;;  %s1268_s25 = int_to_ptr.vmem [resolvable:$true] %s188_s25 }
  0x34   : > { %p1025_p5 = scmp.ne.s32.totalorder %s1266_s14, %s1024_s20  ;;  %p1026_p6 = pneg %p1258_p0 }
  0x35   : > { %s1029_s30 = scalar_lea.hbm %s1515_s1, 4096  ;;  %p1030_p13 = scmp.lt.u32.totalorder %s1266_s14, %s1515_s1 }
  0x36   : > { %p1027_p11 = pnand %p1026_p6, %p1025_p5  ;;  %p1031_p2 = scmp.lt.u32.totalorder %s1029_s30, %s1024_s20 }
  0x37   : > { %p1033_p8 = scmp.lt.u32.totalorder %s1024_s20, %s1266_s14 }
  0x38   : > { %p1028_p12 = pneg %p1027_p11  ;;  %p1032_p3 = por %p1031_p2, %p1030_p13 }
  0x3a   : > { %p1034_p9 = por %p1033_p8, %p1032_p3 }
  0x3c   : > { %p1035_p10 = pnand %p1034_p9, %p1028_p12 }
  0x3e   : > { %1038 = shalt.err (!%p1035_p10)
}
  0x3f   : > { %s1039_s7 = scalar_lea.vmem %s1268_s25, 2048  ;;  %s1129_s10 = smov [#allocation5]  }
  0x40   : > { %p1040_p1 = scmp.ne.s32.totalorder %s1268_s25, %s1039_s7  ;;  %s1044_s12 = sshll.u32 %s1129_s10, 4  ;;  %s1045_s12 = int_to_ptr.vmem [resolvable:$false] %s1044_s12 }
  0x41   : > { %s1046_s13 = scalar_lea.vmem %s1045_s12, 4096  ;;  %p1047_p5 = scmp.lt.s32.totalorder %s1268_s25, %s1045_s12 }
  0x42   : > { %p1042_p4 = pnand %p1040_p1, %p1026_p6  ;;  %p1048_p11 = scmp.lt.s32.totalorder %s1046_s13, %s1039_s7 }
  0x44   : > { %p1043_p7 = pneg %p1042_p4  ;;  %p1049_p13 = por %p1048_p11, %p1047_p5 }
  0x46   : > { %p1050_p2 = pnand %p1049_p13, %p1043_p7 }
  0x48   : > { %1053 = shalt.err (!%p1050_p2)
}
  0x49   : > { %s1130_s5 = smov 256   ;;  %s1131_s20 = smov 128  }
  0x4a   : > { %s1132_s22 = smov 8   ;;  %p1532_p6 = scmp.ne.s32.totalorder %s1527_s29, 0 }
  0x4b   : > { %913 = dma.hbm_to_vmem [thread:$0]  (!%p1258_p0), %s1266_s14, 2048, %s1268_s25, %s1270_s6, %s1130_s5, %s1131_s20, %s1132_s22  }
  0x4c   : > { %216 = sbr.rel (%p1532_p6) target bundleno = 425 (0x1a9), region = 36  ;;  %p1533_p12 = scmp.eq.s32.totalorder (!%p1532_p6), %s1184_s19, 0 }
  0x53   : > { %1099 = dma.done.wait (%p1533_p12), [#allocation3], 512   ;;  %p1534_p3 = pmov %p1533_p12 }
  0x54   : > { %s1305_s23 = sand.u32 1, %s1116_s16   ;;  %p1535_p0 = scmp.ne.s32.totalorder %s1524_s26, 0 }
  0x55   : > { %1101 = vsyncadd (%p1534_p3), [#allocation3], 4294966784  ;;  %s835_s30 = sshll.u32 %s1305_s23, 7  ;;  %s223_s8 = scalar_lea.sflag [#allocation6], %s1305_s23 }
  0x56   : > { %s1309_s11 = scalar_lea.vmem [#allocation5], %s835_s30 }
  0x57   : > { %1103 = dma.done.wait (%p1535_p0), %s223_s8, 2048  }
  0x58   : > { %1105 = vsyncadd (%p1535_p0), %s223_s8, 4294965248  ;;  %v1133_v0 = vmov 0   ;;  %v964_v1 = vld [vmem:[%s1309_s11 + $0x4] ss:$8 sps:$4 sm:$0xff]   ;;  %v966_v2 = vld [vmem:[%s1309_s11] ss:$8 sps:$4 sm:$0xff]  }
  0x59   : > { %432 = vmatprep.mubr.bf16.mxu0 %v1133_v0  ;;  %452 = vmatprep.mubr.bf16.mxu1 %v1133_v0  ;;  %v967_v3 = vld [vmem:[%s1309_s11 + $0x14] ss:$8 sps:$4 sm:$0xff]   ;;  %v969_v4 = vld [vmem:[%s1309_s11 + $0x10] ss:$8 sps:$4 sm:$0xff]   ;;  %v970_v5 = vld [vmem:[%s1309_s11 + $0x24] ss:$8 sps:$4 sm:$0xff]  }
  0x5a   : > { %400 = vmatprep.subr.bf16.mxu0 %v964_v1  ;;  %882 = vmatprep.subr.bf16.mxu1 %v964_v1  ;;  %v972_v6 = vld [vmem:[%s1309_s11 + $0x20] ss:$8 sps:$4 sm:$0xff]   ;;  %v973_v7 = vld [vmem:[%s1309_s11 + $0x34] ss:$8 sps:$4 sm:$0xff]   ;;  %v975_v8 = vld [vmem:[%s1309_s11 + $0x30] ss:$8 sps:$4 sm:$0xff]  }
  0x5b   : > { %401 = vmatpush1.bf16.msra.mxu0 %v966_v2  ;;  %890 = vmatpush1.bf16.msra.mxu1 %v966_v2  ;;  %v976_v9 = vld [vmem:[%s1309_s11 + $0x44] ss:$8 sps:$4 sm:$0xff]   ;;  %v978_v10 = vld [vmem:[%s1309_s11 + $0x40] ss:$8 sps:$4 sm:$0xff]   ;;  %v979_v11 = vld [vmem:[%s1309_s11 + $0x54] ss:$8 sps:$4 sm:$0xff]  }
  0x5c   : > { %402 = vmatprep.subr.bf16.mxu0 %v967_v3  ;;  %883 = vmatprep.subr.bf16.mxu1 %v967_v3  ;;  %v981_v12 = vld [vmem:[%s1309_s11 + $0x50] ss:$8 sps:$4 sm:$0xff]   ;;  %v982_v13 = vld [vmem:[%s1309_s11 + $0x64] ss:$8 sps:$4 sm:$0xff]   ;;  %v984_v14 = vld [vmem:[%s1309_s11 + $0x60] ss:$8 sps:$4 sm:$0xff]  }
  0x5d   : > { %v985_v15 = vld [vmem:[%s1309_s11 + $0x74] ss:$8 sps:$4 sm:$0xff]   ;;  %v987_v16 = vld [vmem:[%s1309_s11 + $0x70] ss:$8 sps:$4 sm:$0xff]   ;;  %v988_v17 = vld [vmem:[#allocation2] sm:$0xff]   ;;  %s837_s26 = sshll.u32 %s1184_s19, 1 }
  0x5e   : > { %v989_v18 = vld [vmem:[#allocation2 + $0x10] sm:$0xff]   ;;  %v990_v19 = vld [vmem:[#allocation2 + $0x8] sm:$0xff]   ;;  %v991_v20 = vld [vmem:[#allocation2 + $0x18] sm:$0xff]   ;;  %p1416_p8 = scmp.lt.s32.totalorder %s837_s26, 3  ;;  %s836_s12 = sshll.u32 %s1305_s23, 6 }
  0x5f   : > { %403 = vmatpush1.bf16.msra.mxu0 %v969_v4  ;;  %891 = vmatpush1.bf16.msra.mxu1 %v969_v4  ;;  %s1453_s13 = scalar_lea.vmem [#allocation7], %s836_s12  ;;  %s881_s20 = sshll.u32 %s1184_s19, 7 }
  0x60   : > { %404 = vmatprep.subr.bf16.mxu0 %v970_v5  ;;  %884 = vmatprep.subr.bf16.mxu1 %v970_v5  ;;  %s1545_s26 = smov (!%p1416_p8, %s837_s26), 3  ;;  %s723_s5 = sshll.u32 %s1453_s13, 4  ;;  %s1457_s5 = int_to_ptr.vmem [resolvable:$true] %s723_s5 }
  0x61   : > { %s263_s25 = scalar_lea.vmem %s1516_s2, %s1545_s26  ;;  %s268_s10 = scalar_lea.vmem %s1517_s3, %s1545_s26 }
  0x62   : > { %s1462_s30 = scalar_lea.hbm %s1518_s4, %s881_s20  ;;  %s710_s8 = scalar_lea.sflag [#allocation4], %s1305_s23 }
  0x63   : > { %405 = vmatpush1.bf16.msra.mxu0 %v972_v6  ;;  %892 = vmatpush1.bf16.msra.mxu1 %v972_v6  ;;  %s1054_s11 = scalar_lea.vmem %s1457_s5, 1024  ;;  %p1537_p10 = scmp.ne.s32.totalorder %s1525_s27, 0 }
  0x64   : > { %406 = vmatprep.subr.bf16.mxu0 %v973_v7  ;;  %885 = vmatprep.subr.bf16.mxu1 %v973_v7  ;;  %p1055_p9 = scmp.ne.s32.totalorder %s1457_s5, %s1054_s11  ;;  %s1134_s26 = smov [#allocation7]  }
  0x65   : > { %s1058_s29 = sshll.u32 %s1134_s26, 4  ;;  %s1059_s29 = int_to_ptr.vmem [resolvable:$false] %s1058_s29 }
  0x66   : > { %p1056_p1 = pnand %p1055_p9, %p1537_p10  ;;  %s1060_s9 = scalar_lea.vmem %s1059_s29, 2048 }
  0x67   : > { %407 = vmatpush1.bf16.msra.mxu0 %v975_v8  ;;  %893 = vmatpush1.bf16.msra.mxu1 %v975_v8  ;;  %p1061_p7 = scmp.lt.s32.totalorder %s1457_s5, %s1059_s29  ;;  %p1062_p5 = scmp.lt.s32.totalorder %s1060_s9, %s1054_s11 }
  0x68   : > { %408 = vmatprep.subr.bf16.mxu0 %v976_v9  ;;  %886 = vmatprep.subr.bf16.mxu1 %v976_v9  ;;  %p1057_p4 = pneg %p1056_p1 }
  0x69   : > { %p1063_p11 = por %p1062_p5, %p1061_p7 }
  0x6b   : > { %409 = vmatpush1.bf16.msra.mxu0 %v978_v10  ;;  %894 = vmatpush1.bf16.msra.mxu1 %v978_v10  ;;  %p1064_p13 = pnand %p1063_p11, %p1057_p4 }
  0x6c   : > { %410 = vmatprep.subr.bf16.mxu0 %v979_v11  ;;  %887 = vmatprep.subr.bf16.mxu1 %v979_v11 }
  0x6f   : > { %411 = vmatpush1.bf16.msra.mxu0 %v981_v12  ;;  %895 = vmatpush1.bf16.msra.mxu1 %v981_v12 }
  0x70   : > { %412 = vmatprep.subr.bf16.mxu0 %v982_v13  ;;  %888 = vmatprep.subr.bf16.mxu1 %v982_v13 }
  0x73   : > { %413 = vmatpush1.bf16.msra.mxu0 %v984_v14  ;;  %896 = vmatpush1.bf16.msra.mxu1 %v984_v14 }
  0x74   : > { %414 = vmatprep.subr.bf16.mxu0 %v985_v15  ;;  %889 = vmatprep.subr.bf16.mxu1 %v985_v15 }
  0x77   : > { %415 = vmatpush1.bf16.msra.mxu0 %v987_v16  ;;  %897 = vmatpush1.bf16.msra.mxu1 %v987_v16 }
  0x7a   : > { %433 = vmatmul.mubr.bf16.vlgmr.msra.gmra.mrb[0].mxu0 %v988_v17  ;;  %453 = vmatmul.mubr.bf16.vlgmr.msra.gmra.mrb[0].mxu1 %v989_v18 }
  0x7b   : > { %442 = vmatprep.mubr.bf16.mxu0 %v1133_v0  ;;  %462 = vmatprep.mubr.bf16.mxu1 %v1133_v0 }
  0x82   : > { %443 = vmatmul.mubr.bf16.gmra.mrb[4].mxu0 %v990_v19  ;;  %463 = vmatmul.mubr.bf16.gmra.mrb[4].mxu1 %v991_v20 }
 0x14d   : > { %v1331_v21 = vpop.f32.mrb[0].mxu0  ;;  %v1333_v22 = vpop.f32.mrb[0].mxu1 }
 0x14e   : > { %v1335_v23 = vpop.f32.mrb[1].mxu0  ;;  %v1337_v24 = vpop.f32.mrb[1].mxu1  ;;  %v499_v27 = vmul.f32 %v1331_v21, %v1331_v21  ;;  %v507_v55 = vmul.f32 %v1333_v22, %v1333_v22 }
 0x14f   : > { %v1339_v25 = vpop.f32.mrb[2].mxu0  ;;  %v1341_v26 = vpop.f32.mrb[2].mxu1  ;;  %v500_v32 = vmul.f32 %v1335_v23, %v1335_v23  ;;  %v508_v58 = vmul.f32 %v1337_v24, %v1337_v24 }
 0x150   : > { %v473_v28 = vadd.f32 %v1339_v25, %v1331_v21  ;;  %v501_v29 = vmul.f32 %v1339_v25, %v1339_v25  ;;  %v1349_v30 = vpop.f32.mrb[3].mxu0  ;;  %v1351_v31 = vpop.f32.mrb[3].mxu1  ;;  %v509_v61 = vmul.f32 %v1341_v26, %v1341_v26 }
 0x151   : > { %v486_v33 = vadd.f32 %v1349_v30, %v1335_v23  ;;  %v502_v34 = vmul.f32 %v1349_v30, %v1349_v30  ;;  %v510_v1 = vmul.f32 %v1351_v31, %v1351_v31 }
 0x152   : > { %v515_v35 = vadd.f32 %v501_v29, %v499_v27 }
 0x153   : > { %v528_v36 = vadd.f32 %v502_v34, %v500_v32 }
 0x155   : > { %v1359_v37 = vpop.f32.mrb[4].mxu0  ;;  %v1361_v38 = vpop.f32.mrb[4].mxu1 }
 0x156   : > { %v474_v39 = vadd.f32 %v473_v28, %v1359_v37  ;;  %v503_v40 = vmul.f32 %v1359_v37, %v1359_v37  ;;  %v1366_v41 = vpop.f32.mrb[5].mxu0  ;;  %v1368_v42 = vpop.f32.mrb[5].mxu1  ;;  %v511_v0 = vmul.f32 %v1361_v38, %v1361_v38 }
 0x157   : > { %v487_v43 = vadd.f32 %v486_v33, %v1366_v41  ;;  %v504_v44 = vmul.f32 %v1366_v41, %v1366_v41  ;;  %v1373_v45 = vpop.f32.mrb[6].mxu0  ;;  %v1375_v46 = vpop.f32.mrb[6].mxu1  ;;  %v512_v4 = vmul.f32 %v1368_v42, %v1368_v42 }
 0x158   : > { %v516_v47 = vadd.f32 %v515_v35, %v503_v40  ;;  %v475_v48 = vadd.f32 %v474_v39, %v1373_v45  ;;  %v505_v49 = vmul.f32 %v1373_v45, %v1373_v45  ;;  %v1380_v50 = vpop.f32.mrb[7].mxu0  ;;  %v1382_v51 = vpop.f32.mrb[7].mxu1  ;;  %v513_v11 = vmul.f32 %v1375_v46, %v1375_v46 }
 0x159   : > { %v529_v52 = vadd.f32 %v528_v36, %v504_v44  ;;  %v488_v53 = vadd.f32 %v487_v43, %v1380_v50  ;;  %v506_v54 = vmul.f32 %v1380_v50, %v1380_v50  ;;  %v514_v14 = vmul.f32 %v1382_v51, %v1382_v51 }
 0x15a   : > { %v476_v56 = vadd.f32 %v475_v48, %v1333_v22  ;;  %v517_v57 = vadd.f32 %v516_v47, %v505_v49 }
 0x15b   : > { %v489_v59 = vadd.f32 %v488_v53, %v1337_v24  ;;  %v530_v60 = vadd.f32 %v529_v52, %v506_v54 }
 0x15c   : > { %v518_v62 = vadd.f32 %v517_v57, %v507_v55  ;;  %v477_v63 = vadd.f32 %v476_v56, %v1341_v26  ;;  %v557_v57 = vlaneseq }
 0x15d   : > { %v531_v2 = vadd.f32 %v530_v60, %v508_v58  ;;  %v490_v3 = vadd.f32 %v489_v59, %v1351_v31 }
 0x15e   : > { %v478_v5 = vadd.f32 %v477_v63, %v1361_v38  ;;  %v519_v6 = vadd.f32 %v518_v62, %v509_v61 }
 0x15f   : > { %v491_v7 = vadd.f32 %v490_v3, %v1368_v42  ;;  %v532_v8 = vadd.f32 %v531_v2, %v510_v1 }
 0x160   : > { %v520_v9 = vadd.f32 %v519_v6, %v511_v0  ;;  %v479_v10 = vadd.f32 %v478_v5, %v1375_v46 }
 0x161   : > { %v533_v12 = vadd.f32 %v532_v8, %v512_v4  ;;  %v492_v13 = vadd.f32 %v491_v7, %v1382_v51 }
 0x162   : > { %v480_v15 = vrot.slane %v479_v10, 4  ;;  %v521_v16 = vadd.f32 %v520_v9, %v513_v11  ;;  %v558_v9 = vshrl.u32 %v557_v57, 7 }
 0x163   : > { %v493_v17 = vrot.slane %v492_v13, 4  ;;  %v534_v18 = vadd.f32 %v533_v12, %v514_v14 }
 0x164   : > { %v481_v19 = vadd.f32 %v480_v15, %v479_v10  ;;  %v522_v20 = vrot.slane %v521_v16, 4  ;;  %v563_v11 = vsub.s32 1, %v558_v9 }
 0x165   : > { %v494_v27 = vadd.f32 %v493_v17, %v492_v13  ;;  %v535_v28 = vrot.slane %v534_v18, 4 }
 0x166   : > { %v482_v29 = vrot.slane %v481_v19, 2  ;;  %v523_v32 = vadd.f32 %v522_v20, %v521_v16 }
 0x167   : > { %v495_v33 = vrot.slane %v494_v27, 2  ;;  %v536_v34 = vadd.f32 %v535_v28, %v534_v18 }
 0x168   : > { %v483_v35 = vadd.f32 %v482_v29, %v481_v19  ;;  %v524_v36 = vrot.slane %v523_v32, 2 }
 0x169   : > { %v496_v39 = vadd.f32 %v495_v33, %v494_v27  ;;  %v537_v40 = vrot.slane %v536_v34, 2 }
 0x16a   : > { %v484_v43 = vrot.slane %v483_v35, 1  ;;  %v525_v44 = vadd.f32 %v524_v36, %v523_v32 }
 0x16b   : > { %v497_v47 = vrot.slane %v496_v39, 1  ;;  %v538_v48 = vadd.f32 %v537_v40, %v536_v34 }
 0x16c   : > { %v485_v49 = vadd.f32 %v484_v43, %v483_v35  ;;  %v526_v52 = vrot.slane %v525_v44, 1 }
 0x16d   : > { %v498_v53 = vadd.f32 %v497_v47, %v496_v39  ;;  %v539_v54 = vrot.slane %v538_v48, 1 }
 0x16e   : > { %v527_v55 = vadd.f32 %v526_v52, %v525_v44  ;;  %v541_v56 = vmul.f32 0.015625, %v485_v49 }
 0x16f   : > { %v540_v58 = vadd.f32 %v539_v54, %v538_v48  ;;  %v1412_v59 = vmul.f32 0.015625, %v498_v53 }
 0x170   : > { %v543_v60 = vmul.f32 0.015625, %v527_v55  ;;  %v545_v61 = vmul.f32 %v541_v56, %v541_v56  ;;  %v569_v62 = vsub.f32 %v1331_v21, %v541_v56  ;;  %v571_v63 = vsub.f32 %v1339_v25, %v541_v56 }
 0x171   : > { %v573_v0 = vsub.f32 %v1359_v37, %v541_v56  ;;  %v575_v1 = vsub.f32 %v1373_v45, %v541_v56  ;;  %v577_v2 = vsub.f32 %v1333_v22, %v541_v56  ;;  %v579_v3 = vsub.f32 %v1341_v26, %v541_v56 }
 0x172   : > { %v547_v4 = vsub.f32 %v543_v60, %v545_v61  ;;  %v581_v5 = vsub.f32 %v1361_v38, %v541_v56  ;;  %v583_v21 = vsub.f32 %v1375_v46, %v541_v56  ;;  %v544_v6 = vmul.f32 0.015625, %v540_v58 }
 0x173   : > { %v546_v25 = vmul.f32 %v1412_v59, %v1412_v59  ;;  %v570_v7 = vsub.f32 %v1335_v23, %v1412_v59  ;;  %v572_v37 = vsub.f32 %v1349_v30, %v1412_v59  ;;  %v574_v22 = vsub.f32 %v1366_v41, %v1412_v59 }
 0x174   : > { %v549_v45 = vmax.f32 %v547_v4, 0.0  ;;  %v576_v26 = vsub.f32 %v1380_v50, %v1412_v59  ;;  %v578_v38 = vsub.f32 %v1337_v24, %v1412_v59  ;;  %v580_v46 = vsub.f32 %v1351_v31, %v1412_v59  ;;  %v555_v31 = vld [vmem:[%s263_s25] sm:$0x3] }
 0x175   : > { %v548_v8 = vsub.f32 %v544_v6, %v546_v25  ;;  %v582_v23 = vsub.f32 %v1368_v42, %v1412_v59  ;;  %v584_v30 = vsub.f32 %v1382_v51, %v1412_v59  ;;  %v559_v50 = vsub.s32 0, %v558_v9  ;;  %v609_v51 = vld [vmem:[%s268_s10] sm:$0x3] }
 0x176   : > { %v551_v41 = vadd.f32 1e-05, %v549_v45  ;;  %v564_v13 = vrot.slane %v555_v31, %v563_v11  ;;  %v618_v52 = vrot.slane %v609_v51, %v563_v11 }
 0x177   : > { %v550_v10 = vmax.f32 %v548_v8, 0.0  ;;  %v560_v42 = vrot.slane %v555_v31, %v559_v50  ;;  %v614_v17 = vrot.slane %v609_v51, %v559_v50 }
 0x178   : > { %992 = vrsqrt.f32 %v551_v41 }
 0x179   : > { %v552_v24 = vadd.f32 1e-05, %v550_v10 }
 0x17b   : > { %994 = vrsqrt.f32 %v552_v24 }
 0x182   : > { %v993_v12 = vpop.eup %992 }
 0x183   : > { %v567_v14 = vmul.f32 %v993_v12, %v560_v42 }
 0x185   : > { %v995_v15 = vpop.eup %994  ;;  %v588_v16 = vrot.slane %v567_v14, %v559_v50 }
 0x186   : > { %v568_v18 = vmul.f32 %v995_v15, %v564_v13 }
 0x187   : > { %v593_v19 = vmul.f32 %v588_v16, %v569_v62  ;;  %v595_v20 = vmul.f32 %v588_v16, %v571_v63  ;;  %v597_v27 = vmul.f32 %v588_v16, %v573_v0  ;;  %v599_v28 = vmul.f32 %v588_v16, %v575_v1 }
 0x188   : > { %v601_v29 = vmul.f32 %v588_v16, %v577_v2  ;;  %v603_v32 = vmul.f32 %v588_v16, %v579_v3  ;;  %v605_v33 = vmul.f32 %v588_v16, %v581_v5  ;;  %v607_v34 = vmul.f32 %v588_v16, %v583_v21 }
 0x189   : > { %v621_v35 = vadd.f32 %v614_v17, %v593_v19  ;;  %v623_v36 = vadd.f32 %v614_v17, %v595_v20  ;;  %v625_v39 = vadd.f32 %v614_v17, %v597_v27  ;;  %v627_v40 = vadd.f32 %v614_v17, %v599_v28 }
 0x18a   : > { %v629_v43 = vadd.f32 %v614_v17, %v601_v29  ;;  %v631_v44 = vadd.f32 %v614_v17, %v603_v32  ;;  %v633_v47 = vadd.f32 %v614_v17, %v605_v33  ;;  %v635_v48 = vadd.f32 %v614_v17, %v607_v34 }
 0x18b   : > { %v637_v49 = vmax.f32 %v621_v35, 0.0  ;;  %v639_v53 = vmax.f32 %v623_v36, 0.0  ;;  %v641_v54 = vmax.f32 %v625_v39, 0.0  ;;  %v643_v55 = vmax.f32 %v627_v40, 0.0 }
 0x18c   : > { %v592_v56 = vrot.slane %v568_v18, %v559_v50  ;;  %v645_v57 = vmax.f32 %v629_v43, 0.0  ;;  %v647_v58 = vmax.f32 %v631_v44, 0.0  ;;  %v649_v59 = vmax.f32 %v633_v47, 0.0 }
 0x18d   : > { %v651_v60 = vmax.f32 %v635_v48, 0.0 }
 0x18e   : > { %v594_v61 = vmul.f32 %v592_v56, %v570_v7  ;;  %v596_v62 = vmul.f32 %v592_v56, %v572_v37  ;;  %v598_v63 = vmul.f32 %v592_v56, %v574_v22  ;;  %v600_v0 = vmul.f32 %v592_v56, %v576_v26 }
 0x18f   : > { %v602_v1 = vmul.f32 %v592_v56, %v578_v38  ;;  %v604_v2 = vmul.f32 %v592_v56, %v580_v46  ;;  %v606_v3 = vmul.f32 %v592_v56, %v582_v23  ;;  %v608_v4 = vmul.f32 %v592_v56, %v584_v30 }
 0x190   : > { %v622_v5 = vadd.f32 %v618_v52, %v594_v61  ;;  %v624_v21 = vadd.f32 %v618_v52, %v596_v62  ;;  %v626_v6 = vadd.f32 %v618_v52, %v598_v63  ;;  %v628_v25 = vadd.f32 %v618_v52, %v600_v0 }
 0x191   : > { %v630_v45 = vadd.f32 %v618_v52, %v602_v1  ;;  %v632_v8 = vadd.f32 %v618_v52, %v604_v2  ;;  %v634_v41 = vadd.f32 %v618_v52, %v606_v3  ;;  %v636_v7 = vadd.f32 %v618_v52, %v608_v4 }
 0x192   : > { %v638_v37 = vmax.f32 %v622_v5, 0.0  ;;  %v640_v22 = vmax.f32 %v624_v21, 0.0  ;;  %v642_v26 = vmax.f32 %v626_v6, 0.0  ;;  %v644_v38 = vmax.f32 %v628_v25, 0.0 }
 0x193   : > { %v646_v46 = vmax.f32 %v630_v45, 0.0  ;;  %v648_v23 = vmax.f32 %v632_v8, 0.0  ;;  %v650_v30 = vmax.f32 %v634_v41, 0.0  ;;  %v652_v9 = vmax.f32 %v636_v7, 0.0 }
 0x194   : > { %v873_v10 = vpack.c.bf16 %v638_v37, %v637_v49  ;;  %v874_v24 = vpack.c.bf16 %v640_v22, %v639_v53  ;;  %v875_v50 = vpack.c.bf16 %v642_v26, %v641_v54  ;;  %v876_v31 = vpack.c.bf16 %v644_v38, %v643_v55 }
 0x195   : > { %v877_v11 = vpack.c.bf16 %v646_v46, %v645_v57  ;;  %v878_v42 = vpack.c.bf16 %v648_v23, %v647_v58  ;;  %v879_v12 = vpack.c.bf16 %v650_v30, %v649_v59  ;;  %v880_v51 = vpack.c.bf16 %v652_v9, %v651_v60 }
 0x196   : > { %701 = vst [vmem:[%s1453_s13] sm:$0xff] %v873_v10  ;;  %702 = vst [vmem:[%s1453_s13 + $0x8] sm:$0xff] %v874_v24 }
 0x197   : > { %703 = vst [vmem:[%s1453_s13 + $0x10] sm:$0xff] %v875_v50  ;;  %704 = vst [vmem:[%s1453_s13 + $0x18] sm:$0xff] %v876_v31 }
 0x198   : > { %705 = vst [vmem:[%s1453_s13 + $0x20] sm:$0xff] %v877_v11  ;;  %706 = vst [vmem:[%s1453_s13 + $0x28] sm:$0xff] %v878_v42 }
 0x199   : > { %707 = vst [vmem:[%s1453_s13 + $0x30] sm:$0xff] %v879_v12  ;;  %708 = vst [vmem:[%s1453_s13 + $0x38] sm:$0xff] %v880_v51 }
 0x19a   : > { %1067 = shalt.err (!%p1064_p13)
}
 0x19b   : > { %s1068_s14 = scalar_lea.hbm %s1462_s30, 1024  ;;  %s1072_s7 = scalar_lea.hbm %s1518_s4, 2048 }
 0x19c   : > { %p1069_p2 = scmp.ne.s32.totalorder %s1462_s30, %s1068_s14  ;;  %p1073_p3 = scmp.lt.u32.totalorder %s1462_s30, %s1518_s4 }
 0x19d   : > { %p1074_p0 = scmp.lt.u32.totalorder %s1072_s7, %s1068_s14  ;;  %p1076_p9 = scmp.lt.u32.totalorder %s1068_s14, %s1462_s30 }
 0x19e   : > { %p1070_p6 = pnand %p1069_p2, %p1537_p10 }
 0x19f   : > { %p1075_p8 = por %p1074_p0, %p1073_p3 }
 0x1a0   : > { %p1071_p12 = pneg %p1070_p6 }
 0x1a1   : > { %p1077_p1 = por %p1076_p9, %p1075_p8 }
 0x1a3   : > { %p1078_p4 = pnand %p1077_p1, %p1071_p12 }
 0x1a5   : > { %1081 = shalt.err (!%p1078_p4)
}
 0x1a6   : > { %s1135_s13 = smov 128   ;;  %s1136_s20 = smov 256  }
 0x1a7   : > { %s1137_s19 = smov 8  }
 0x1a8   : > { %904 = dma.vmem_to_hbm [thread:$0]  (%p1537_p10), %s1457_s5, 1024, %s1462_s30, %s710_s8, %s1135_s13, %s1136_s20, %s1137_s19  }
 0x1a9 PF: > { %s738_s22 = sand.u32 1, %s1112_s15   ;;  %p1538_p7 = scmp.ne.s32.totalorder %s1526_s28, 0 }
 0x1aa   : > { %p1539_p5 = scmp.ge.s32.totalorder %s1124_s18, 2  ;;  %s739_s11 = scalar_lea.sflag [#allocation4], %s738_s22 }
 0x1ac   : > { %p915_p11 = pnand %p1539_p5, %p1538_p7 }
 0x1ae   : > { %1107 = dma.done.wait (!%p915_p11), %s739_s11, 1024  }
 0x1af   : > { %1109 = vsyncadd (!%p915_p11), %s739_s11, 4294966272  ;;  %p18_p13 = scmp.ge.s32.totalorder %s1188_s21, 4   ;;  %s1540_s15 = smov %s1116_s16 }
 0x1b0   : > { %s1541_s16 = smov %s1120_s17  ;;  %s1542_s17 = smov %s1200_s24 }
 0x1b1   : > { %s1543_s18 = smov %s1188_s21  ;;  %20 = sbr.rel (!%p18_p13) target bundleno = 6 (0x6), region = 92 }
 0x1b8   :  { %744 = vsyncpa [#allocation3], 1 }
 0x1b9   :  { %746 = vsyncpa [#allocation3 + $0x1], 1 }
 0x1ba   :  { %747 = vsyncpa [#allocation6], 1 }
 0x1bb   :  { %749 = vsyncpa [#allocation6 + $0x1], 1 }
 0x1bc   :  { %750 = vsyncpa [#allocation4], 1 }
 0x1bd   :  { %752 = vsyncpa [#allocation4 + $0x1], 1 }

</bundles_post_ra>
